<compile_context>
chip_gen: v7x
topology: tpu7x:2x2x1
jax: 0.10.0
libtpu: 0.0.40
codegen_flags: <defaults>
</compile_context>

<pallas_src>
import jax
import jax.numpy as jnp
from jax.experimental import pallas as pl
from jax.experimental.pallas import tpu as pltpu


def _laplace_kernel(x_ref, o_ref):
    x = x_ref[...].astype(jnp.float32)              # (TB, C, H, W)
    s = jnp.sum(x, axis=1)                          # (TB, H, W) channel sum
    tb, h, w = s.shape

    zrow = jnp.zeros((tb, 1, w), jnp.float32)
    zcol = jnp.zeros((tb, h, 1), jnp.float32)
    # Zero-padded neighbor shifts (static slices + concatenate; no wraparound).
    up    = jnp.concatenate([zrow, s[:, :-1, :]], axis=1)   # s[y-1, x]
    down  = jnp.concatenate([s[:, 1:, :], zrow], axis=1)    # s[y+1, x]
    left  = jnp.concatenate([zcol, s[:, :, :-1]], axis=2)   # s[y, x-1]
    right = jnp.concatenate([s[:, :, 1:], zcol], axis=2)    # s[y, x+1]
    lap = up + down + left + right - 4.0 * s                # (TB, H, W)

    o_ref[...] = (x - lap[:, None, :, :]).astype(o_ref.dtype)


def _pick_batch_tile(n, c, h, w, itemsize, target_bytes=2 << 20):
    """Largest divisor of n whose (tb, c, h, w) block stays <= target_bytes."""
    per_image = max(1, c * h * w * itemsize)
    cap = max(1, target_bytes // per_image)
    tb = 1
    for d in range(1, n + 1):
        if n % d == 0 and d <= cap:
            tb = d
    return tb


@jax.jit
def laplace_algorithm(image):
    """Pallas equivalent of LaplaceAlogrithm.forward for NCHW input (C == 3)."""
    n, c, h, w = image.shape
    itemsize = jnp.dtype(image.dtype).itemsize
    tb = _pick_batch_tile(n, c, h, w, itemsize)

    flops = 10 * n * c * h * w                # channel sum + stencil + subtract
    bytes_accessed = 2 * n * c * h * w * itemsize

    return pl.pallas_call(
        _laplace_kernel,
        out_shape=jax.ShapeDtypeStruct((n, c, h, w), image.dtype),
        grid_spec=pltpu.PrefetchScalarGridSpec(
            num_scalar_prefetch=0,
            grid=(n // tb,),
            in_specs=[pl.BlockSpec((tb, c, h, w), lambda i: (i, 0, 0, 0))],
            out_specs=pl.BlockSpec((tb, c, h, w), lambda i: (i, 0, 0, 0)),
        ),
        compiler_params=pltpu.CompilerParams(
            dimension_semantics=("parallel",),
        ),
        cost_estimate=pl.CostEstimate(
            flops=flops, transcendentals=0, bytes_accessed=bytes_accessed),
    )(image)


def _laplace_ref(image):
    """Pure-JAX reference matching the PyTorch module."""
    xf = image.astype(jnp.float32)
    s = jnp.sum(xf, axis=1)                                   # (N, H, W)
    p = jnp.pad(s, ((0, 0), (1, 1), (1, 1)))
    lap = (p[:, :-2, 1:-1] + p[:, 2:, 1:-1]
           + p[:, 1:-1, :-2] + p[:, 1:-1, 2:] - 4.0 * s)
    return (xf - lap[:, None, :, :]).astype(image.dtype)


if __name__ == "__main__":
    key = jax.random.PRNGKey(0)
    # The PyTorch module hard-codes a 3-input-channel Laplace weight.
    x = jax.random.normal(key, (2, 3, 16, 16), dtype=jnp.float32)

    out = laplace_algorithm(x)
    out = jax.block_until_ready(out)

    ref = _laplace_ref(x)
    assert out.shape == ref.shape and out.dtype == ref.dtype
    assert jnp.allclose(out, ref, rtol=1e-5, atol=1e-5), (out, ref)

    print("KERNEL_OK")
</pallas_src>

<mosaic_0001>
module attributes {stable_mosaic.version = 11 : i64} {
  func.func @_laplace_kernel(%arg0: i32, %arg1: memref<2x3x16x16xf32, #tpu.memory_space<vmem>>, %arg2: memref<2x3x16x16xf32, #tpu.memory_space<vmem>>) attributes {dimension_semantics = [#tpu.dimension_semantics<parallel>], iteration_bounds = array<i64: 1>, scalar_prefetch = 0 : i64, scratch_operands = 0 : i64, tpu.core_type = #tpu.core_type<tc>, window_params = [{transform_indices = @transform_0, window_bounds = array<i64: 2, 3, 16, 16>}, {transform_indices = @transform_1, window_bounds = array<i64: 2, 3, 16, 16>}]} {
    %c0 = arith.constant 0 : index
    %c0_0 = arith.constant 0 : index
    %c0_1 = arith.constant 0 : index
    %c0_2 = arith.constant 0 : index
    %0 = vector.load %arg1[%c0, %c0_0, %c0_1, %c0_2] : memref<2x3x16x16xf32, #tpu.memory_space<vmem>>, vector<2x3x16x16xf32>
    %cst = arith.constant dense<0.000000e+00> : vector<2x16x16xf32>
    %1 = vector.multi_reduction <add>, %0, %cst [1] : vector<2x3x16x16xf32> to vector<2x16x16xf32>
    %cst_3 = arith.constant 0.000000e+00 : f32
    %2 = vector.broadcast %cst_3 : f32 to vector<2x1x16xf32>
    %cst_4 = arith.constant 0.000000e+00 : f32
    %3 = vector.broadcast %cst_4 : f32 to vector<2x16x1xf32>
    %4 = vector.extract_strided_slice %1 {offsets = [0, 0, 0], sizes = [2, 15, 16], strides = [1, 1, 1]} : vector<2x16x16xf32> to vector<2x15x16xf32>
    %5 = tpu.concatenate %2, %4 in 1 : vector<2x1x16xf32>, vector<2x15x16xf32> -> vector<2x16x16xf32>
    %6 = vector.extract_strided_slice %1 {offsets = [0, 1, 0], sizes = [2, 15, 16], strides = [1, 1, 1]} : vector<2x16x16xf32> to vector<2x15x16xf32>
    %7 = tpu.concatenate %6, %2 in 1 : vector<2x15x16xf32>, vector<2x1x16xf32> -> vector<2x16x16xf32>
    %8 = vector.extract_strided_slice %1 {offsets = [0, 0, 0], sizes = [2, 16, 15], strides = [1, 1, 1]} : vector<2x16x16xf32> to vector<2x16x15xf32>
    %9 = tpu.concatenate %3, %8 in 2 : vector<2x16x1xf32>, vector<2x16x15xf32> -> vector<2x16x16xf32>
    %10 = vector.extract_strided_slice %1 {offsets = [0, 0, 1], sizes = [2, 16, 15], strides = [1, 1, 1]} : vector<2x16x16xf32> to vector<2x16x15xf32>
    %11 = tpu.concatenate %10, %3 in 2 : vector<2x16x15xf32>, vector<2x16x1xf32> -> vector<2x16x16xf32>
    %12 = arith.addf %5, %7 : vector<2x16x16xf32>
    %13 = arith.addf %12, %9 : vector<2x16x16xf32>
    %14 = arith.addf %13, %11 : vector<2x16x16xf32>
    %cst_5 = arith.constant 4.000000e+00 : f32
    %15 = vector.broadcast %cst_5 : f32 to vector<2x16x16xf32>
    %16 = arith.mulf %15, %1 : vector<2x16x16xf32>
    %17 = arith.subf %14, %16 : vector<2x16x16xf32>
    %18 = vector.shape_cast %17 : vector<2x16x16xf32> to vector<2x1x16x16xf32>
    %19 = vector.broadcast %18 : vector<2x1x16x16xf32> to vector<2x3x16x16xf32>
    %20 = arith.subf %0, %19 : vector<2x3x16x16xf32>
    %c0_6 = arith.constant 0 : index
    %c0_7 = arith.constant 0 : index
    %c0_8 = arith.constant 0 : index
    %c0_9 = arith.constant 0 : index
    %21 = vector.load %arg2[%c0_6, %c0_7, %c0_8, %c0_9] : memref<2x3x16x16xf32, #tpu.memory_space<vmem>>, vector<2x3x16x16xf32>
    tpu.vector_store %arg2[%c0_6, %c0_7, %c0_8, %c0_9], %20 {strides = array<i32>} : memref<2x3x16x16xf32, #tpu.memory_space<vmem>>, vector<2x3x16x16xf32>,
    return
  }
  func.func @transform_0(%arg0: i32) -> (i32, i32, i32, i32) {
    %c0_i32 = arith.constant 0 : i32
    %c0_i32_0 = arith.constant 0 : i32
    %c0_i32_1 = arith.constant 0 : i32
    %c0_i32_2 = arith.constant 0 : i32
    return %arg0, %c0_i32, %c0_i32_0, %c0_i32_1 : i32, i32, i32, i32
  }
  func.func @transform_1(%arg0: i32) -> (i32, i32, i32, i32) {
    %c0_i32 = arith.constant 0 : i32
    %c0_i32_0 = arith.constant 0 : i32
    %c0_i32_1 = arith.constant 0 : i32
    %c0_i32_2 = arith.constant 0 : i32
    return %arg0, %c0_i32, %c0_i32_0, %c0_i32_1 : i32, i32, i32, i32
  }
}

</mosaic_0001>

<bundles_post_ra>
// kernel: laplace_algorithm.1
= control target key start
LH: loop header
LB: loop body
LE: loop exit
PB: predicated region body
PF: predicated region fallthrough
CT: control target
= control target key end

     0   :  { %6 = vsyncpa [#allocation3], 0  ;;  %s372_s0 = inlined_call_operand.hbm [shape: f32[2,3,16,16], index: 0, kind: input, shape index: {}]   ;;  %s373_s1 = inlined_call_operand.hbm [shape: f32[2,3,16,16], index: 1, kind: output, shape index: {}]  }
   0x1   :  { %7 = vsyncpa [#allocation4], 0  ;;  %s235_s6 = smov [#allocation2]   ;;  %s187_s10 = scalar_lea.hbm %s372_s0, 1536 }
   0x2   :  { %s13_s7 = sshll.u32 %s235_s6, 4  ;;  %p188_p0 = scmp.ne.s32.totalorder %s372_s0, %s187_s10  ;;  %s14_s7 = int_to_ptr.vmem [resolvable:$true] %s13_s7 }
   0x3   :  { %p191_p1 = scmp.lt.u32.totalorder %s187_s10, %s372_s0 }
   0x5   :  { %p193_p2 = pnand %p191_p1, %p188_p0 }
   0x7   :  { %196 = shalt.err (!%p193_p2)
}
   0x8   :  { %s197_s15 = scalar_lea.vmem %s14_s7, 1536  ;;  %p202_p4 = scmp.lt.s32.totalorder %s14_s7, %s14_s7 }
   0x9   :  { %p198_p3 = scmp.ne.s32.totalorder %s14_s7, %s197_s15  ;;  %p203_p5 = scmp.lt.s32.totalorder %s197_s15, %s197_s15 }
   0xb   :  { %p204_p6 = por %p203_p5, %p202_p4 }
   0xd   :  { %p205_p7 = pnand %p204_p6, %p198_p3 }
   0xf   :  { %208 = shalt.err (!%p205_p7)
}
  0x10   :  { %s236_s16 = smov 128   ;;  %s237_s17 = smov 8  }
  0x11   :  { %19 = dma.hbm_to_vmem [thread:$0]  %s372_s0, 1536, %s14_s7, [#allocation3], %s236_s16, %s236_s16, %s237_s17  }
  0x12   :  { %231 = dma.done.wait [#allocation3], 1536  }
  0x13   :  { %232 = vsyncadd [#allocation3], 4294965760  ;;  %vm35_vm0 = vcmask 130048   ;;  %v266_v0 = vld [vmem:[#allocation2 + $0x30] sm:$0xff]  ;;  %v268_v1 = vld [vmem:[#allocation2 + $0x40] sm:$0xff]  ;;  %vm60_vm1 = vcmask 1040384  }
  0x14   :  { %v270_v2 = vld [vmem:[#allocation2 + $0x50] sm:$0xff]  ;;  %v46_v3 = vsel %vm35_vm0, %v266_v0, 0.0  ;;  %v47_v4 = vsel %vm35_vm0, %v268_v1, 0.0  ;;  %v278_v6 = vld [vmem:[#allocation2] sm:$0xff]  ;;  %v290_v13 = vld [vmem:[#allocation2 + $0x38] sm:$0xff]  ;;  %s238_s0 = smov 1  }
  0x15   :  { %v49_v5 = vsel %vm35_vm0, %v270_v2, 0.0  ;;  %v280_v7 = vld [vmem:[#allocation2 + $0x10] sm:$0xff]  ;;  %v282_v8 = vld [vmem:[#allocation2 + $0x20] sm:$0xff]  ;;  %v48_v9 = vadd.f32 %v47_v4, %v46_v3  ;;  %v36_v10 = vsel %vm35_vm0, %v278_v6, 0.0  ;;  %v292_v14 = vld [vmem:[#allocation2 + $0x48] sm:$0xff]  ;;  %v51_v17 = vsel %vm35_vm0, %v290_v13, 0.0 }
  0x16   :  { %v37_v11 = vsel %vm35_vm0, %v280_v7, 0.0  ;;  %v39_v12 = vsel %vm35_vm0, %v282_v8, 0.0  ;;  %v294_v15 = vld [vmem:[#allocation2 + $0x58] sm:$0xff]  ;;  %v52_v18 = vsel %vm35_vm0, %v292_v14, 0.0  ;;  %v302_v20 = vld [vmem:[#allocation2 + $0x8] sm:$0xff]  ;;  %vm73_vm2 = vcmask 1046528  }
  0x17   :  { %v38_v16 = vadd.f32 %v37_v11, %v36_v10  ;;  %v54_v19 = vsel %vm35_vm0, %v294_v15, 0.0  ;;  %v304_v21 = vld [vmem:[#allocation2 + $0x18] sm:$0xff]  ;;  %v306_v22 = vld [vmem:[#allocation2 + $0x28] sm:$0xff]  ;;  %v308_v23 = vadd.f32 %v49_v5, %v48_v9  ;;  %v53_v24 = vadd.f32 %v52_v18, %v51_v17  ;;  %s239_s20 = smov 127   ;;  %s240_s21 = smov [#allocation5]  }
  0x18   :  { %v41_v25 = vsel %vm35_vm0, %v302_v20, 0.0  ;;  %v42_v26 = vsel %vm35_vm0, %v304_v21, 0.0  ;;  %v44_v29 = vsel %vm35_vm0, %v306_v22, 0.0  ;;  %vm98_vm3 = vcmask 7168   ;;  %s169_s22 = sshll.u32 %s240_s21, 4  ;;  %s170_s22 = int_to_ptr.vmem [resolvable:$true] %s169_s22 }
  0x19   :  { %v40_v27 = vadd.f32 %v39_v12, %v38_v16  ;;  %v43_v28 = vadd.f32 %v42_v26, %v41_v25  ;;  %90 = vrot.lane.b32.xlu1 %v308_v23, %s238_s0  ;;  %v55_v30 = vadd.f32 %v54_v19, %v53_v24  ;;  %v64_v31 = vrot.slane %v308_v23, 7  ;;  %s209_s23 = scalar_lea.vmem %s170_s22, 1536  ;;  %p214_p9 = scmp.lt.s32.totalorder %s170_s22, %s170_s22 }
  0x1a   :  { %v77_v32 = vrot.slane %v308_v23, 1  ;;  %vm115_vm4 = vcmask 121856   ;;  %v134_v26 = vmul.f32 4.0, %v308_v23  ;;  %p210_p8 = scmp.ne.s32.totalorder %s170_s22, %s209_s23  ;;  %p215_p10 = scmp.lt.s32.totalorder %s209_s23, %s209_s23 }
  0x1b   :  { %86 = vrot.lane.b32.xlu0 %v40_v27, %s238_s0  ;;  %v45_v33 = vadd.f32 %v44_v29, %v43_v28  ;;  %v61_v34 = vrot.slane %v40_v27, 7  ;;  %v74_v35 = vrot.slane %v40_v27, 1  ;;  %v78_v36 = vrot.slane %v55_v30, 1 }
  0x1c   :  { %v72_v37 = vsel %vm60_vm1, 0.0, %v64_v31  ;;  %v65_v38 = vrot.slane %v55_v30, 7  ;;  %v132_v4 = vmul.f32 4.0, %v40_v27  ;;  %v135_v17 = vmul.f32 4.0, %v55_v30  ;;  %p216_p11 = por %p215_p10, %p214_p9 }
  0x1d   :  { %v75_v39 = vrot.slane %v45_v33, 1  ;;  %v71_v40 = vsel %vm60_vm1, 0.0, %v61_v34  ;;  %v62_v41 = vrot.slane %v45_v33, 7  ;;  %92 = vrot.lane.b32.xlu1 %v55_v30, %s238_s0  ;;  %v79_v42 = vsel %vm73_vm2, %v77_v32, %v78_v36 }
  0x1e   :  { %v85_v43 = vsel %vm73_vm2, %v78_v36, 0.0  ;;  %v66_v44 = vsel %vm60_vm1, %v64_v31, %v65_v38  ;;  %v122_v45 = vadd.f32 %v79_v42, %v72_v37  ;;  %v133_v60 = vmul.f32 4.0, %v45_v33  ;;  %p217_p12 = pnand %p216_p11, %p210_p8 }
  0x1f   :  { %88 = vrot.lane.b32.xlu0 %v45_v33, %s238_s0  ;;  %v76_v46 = vsel %vm73_vm2, %v74_v35, %v75_v39  ;;  %v123_v47 = vadd.f32 %v85_v43, %v66_v44  ;;  %v84_v48 = vsel %vm73_vm2, %v75_v39, 0.0  ;;  %v63_v50 = vsel %vm60_vm1, %v61_v34, %v62_v41 }
  0x20   :  { %v120_v49 = vadd.f32 %v76_v46, %v71_v40  ;;  %v121_v51 = vadd.f32 %v84_v48, %v63_v50 }
  0x21   :  { %105 = vrot.lane.b32.xlu1 %v45_v33, %s239_s20 }
  0x23   :  { %103 = vrot.lane.b32.xlu0 %v40_v27, %s239_s20 }
  0x25   :  { %109 = vrot.lane.b32.xlu1 %v55_v30, %s239_s20 }
  0x27   :  { %107 = vrot.lane.b32.xlu0 %v308_v23, %s239_s20 }
  0x8b   :  { %v91_v52 = vpop.permute.xlu1 %90 }
  0x8c   :  { %v101_v5 = vsel %vm98_vm3, 0.0, %v91_v52 }
  0x8d   :  { %v87_v53 = vpop.permute.xlu0 %86  ;;  %v126_v19 = vadd.f32 %v122_v45, %v101_v5 }
  0x8e   :  { %v99_v56 = vsel %vm98_vm3, 0.0, %v87_v53 }
  0x8f   :  { %v93_v54 = vpop.permute.xlu1 %92  ;;  %v124_v61 = vadd.f32 %v120_v49, %v99_v56 }
  0x90   :  { %v102_v62 = vsel %vm98_vm3, 0.0, %v93_v54 }
  0x91   :  { %v89_v55 = vpop.permute.xlu0 %88  ;;  %v127_v12 = vadd.f32 %v123_v47, %v102_v62 }
  0x92   :  { %v100_v57 = vsel %vm98_vm3, 0.0, %v89_v55 }
  0x93   :  { %v125_v58 = vadd.f32 %v121_v51, %v100_v57  ;;  %v106_v59 = vpop.permute.xlu1 %105 }
  0x94   :  { %v117_v63 = vsel %vm115_vm4, %v106_v59, 0.0 }
  0x95   :  { %v104_v3 = vpop.permute.xlu0 %103  ;;  %v129_v9 = vadd.f32 %v125_v58, %v117_v63 }
  0x96   :  { %v116_v10 = vsel %vm115_vm4, %v104_v3, 0.0 }
  0x97   :  { %v128_v11 = vadd.f32 %v124_v61, %v116_v10  ;;  %v137_v16 = vsub.f32 %v129_v9, %v133_v60  ;;  %v110_v18 = vpop.permute.xlu1 %109 }
  0x98   :  { %v119_v25 = vsel %vm115_vm4, %v110_v18, 0.0 }
  0x99   :  { %v136_v24 = vsub.f32 %v128_v11, %v132_v4  ;;  %v108_v28 = vpop.permute.xlu0 %107  ;;  %v141_v29 = vsub.f32 %v302_v20, %v137_v16  ;;  %v143_v27 = vsub.f32 %v304_v21, %v137_v16  ;;  %v145_v31 = vsub.f32 %v306_v22, %v137_v16 }
  0x9a   :  { %v131_v32 = vadd.f32 %v127_v12, %v119_v25  ;;  %v118_v35 = vsel %vm115_vm4, %v108_v28, 0.0 }
  0x9b   :  { %v140_v33 = vsub.f32 %v278_v6, %v136_v24  ;;  %v142_v34 = vsub.f32 %v280_v7, %v136_v24  ;;  %v144_v30 = vsub.f32 %v282_v8, %v136_v24  ;;  %153 = vst.msk [vmem:[#allocation5 + $0x8] sm:$0xff] %vm35_vm0, %v141_v29  ;;  %155 = vst.msk [vmem:[#allocation5 + $0x18] sm:$0xff] %vm35_vm0, %v143_v27 }
  0x9c   :  { %157 = vst.msk [vmem:[#allocation5 + $0x28] sm:$0xff] %vm35_vm0, %v145_v31  ;;  %v139_v20 = vsub.f32 %v131_v32, %v135_v17  ;;  %v130_v23 = vadd.f32 %v126_v19, %v118_v35 }
  0x9d   :  { %152 = vst.msk [vmem:[#allocation5] sm:$0xff] %vm35_vm0, %v140_v33  ;;  %154 = vst.msk [vmem:[#allocation5 + $0x10] sm:$0xff] %vm35_vm0, %v142_v34 }
  0x9e   :  { %156 = vst.msk [vmem:[#allocation5 + $0x20] sm:$0xff] %vm35_vm0, %v144_v30  ;;  %v147_v6 = vsub.f32 %v290_v13, %v139_v20  ;;  %v149_v7 = vsub.f32 %v292_v14, %v139_v20  ;;  %v151_v8 = vsub.f32 %v294_v15, %v139_v20  ;;  %v138_v21 = vsub.f32 %v130_v23, %v134_v26 }
  0xa0   :  { %159 = vst.msk [vmem:[#allocation5 + $0x38] sm:$0xff] %vm35_vm0, %v147_v6  ;;  %161 = vst.msk [vmem:[#allocation5 + $0x48] sm:$0xff] %vm35_vm0, %v149_v7  ;;  %v146_v22 = vsub.f32 %v266_v0, %v138_v21  ;;  %v148_v36 = vsub.f32 %v268_v1, %v138_v21  ;;  %v150_v37 = vsub.f32 %v270_v2, %v138_v21 }
  0xa1   :  { %163 = vst.msk [vmem:[#allocation5 + $0x58] sm:$0xff] %vm35_vm0, %v151_v8 }
  0xa2   :  { %158 = vst.msk [vmem:[#allocation5 + $0x30] sm:$0xff] %vm35_vm0, %v146_v22  ;;  %160 = vst.msk [vmem:[#allocation5 + $0x40] sm:$0xff] %vm35_vm0, %v148_v36 }
  0xa3   :  { %162 = vst.msk [vmem:[#allocation5 + $0x50] sm:$0xff] %vm35_vm0, %v150_v37 }
  0xa4   :  { %220 = shalt.err (!%p217_p12)
}
  0xa5   :  { %s221_s26 = scalar_lea.hbm %s373_s1, 1536 }
  0xa6   :  { %p222_p13 = scmp.ne.s32.totalorder %s373_s1, %s221_s26  ;;  %p225_p0 = scmp.lt.u32.totalorder %s221_s26, %s373_s1 }
  0xa8   :  { %p227_p1 = pnand %p225_p0, %p222_p13 }
  0xaa   :  { %230 = shalt.err (!%p227_p1)
}
  0xab   :  { %175 = dma.vmem_to_hbm [thread:$0]  %s170_s22, 1536, %s373_s1, [#allocation4], %s236_s16, %s236_s16, %s237_s17  }
  0xac   :  { %233 = dma.done.wait [#allocation4], 1536  }
  0xad   :  { %234 = vsyncadd [#allocation4], 4294965760 }
  0xae   :  { %179 = vsyncpa [#allocation3], 1 }
  0xaf   :  { %180 = vsyncpa [#allocation4], 1 }

</bundles_post_ra>
